<compile_context>
chip_gen: v7x
topology: tpu7x:2x2x1
jax: 0.10.0
libtpu: 0.0.40
codegen_flags: <defaults>
</compile_context>

<pallas_src>
import functools

import jax
import jax.numpy as jnp
from jax import lax
from jax.experimental import pallas as pl
from jax.experimental.pallas import tpu as pltpu


def _round_up(x, m):
    return (x + m - 1) // m * m


def pack_params(w1, b1, w2, b2):
    """Pack all four parameters into ONE f32 buffer (one resident VMEM fetch).

    Row layout (last dim = H, no lane padding):
      rows [0, F)      : w1            (F x H)
      row  F           : b1            (H lanes)
      row  F + 1       : w2 as a row   (H lanes)
      row  F + 2, lane0: b2
    Rows are padded up to a multiple of 8 (f32 sublane tile).
    """
    F, H = w1.shape
    n_rows = _round_up(F + 3, 8)
    p = jnp.zeros((n_rows, H), jnp.float32)
    p = p.at[:F, :].set(w1.astype(jnp.float32))
    p = p.at[F, :].set(jnp.reshape(b1, (H,)).astype(jnp.float32))
    p = p.at[F + 1, :].set(jnp.reshape(w2, (H,)).astype(jnp.float32))
    p = p.at[F + 2, 0].set(jnp.reshape(b2, ()).astype(jnp.float32))
    return p


def mlp_kernel(x_ref, p_ref, o_ref, *, n_in):
    f = n_in
    x = x_ref[...]                                  # (tm, F), f32 or bf16

    w1 = p_ref[0:f, :]                              # (F, H) f32
    b1 = p_ref[f:f + 1, :]                          # (1, H) f32
    w2 = p_ref[f + 1:f + 2, :]                      # (1, H) f32
    b2 = p_ref[f + 2:f + 3, 0:1]                    # (1, 1) f32

    if x.dtype != jnp.float32:
        # bf16 MXU operands (v6e/v7x); w1 is tiny & resident so this cast is cheap.
        w1 = w1.astype(x.dtype)

    # fc1 on the MXU, f32 accumulate; bias + ReLU on the VPU in f32.
    h = jnp.dot(x, w1, preferred_element_type=jnp.float32)     # (tm, H)
    h = jnp.maximum(h + b1, 0.0)

    # fc2 as w2 . h^T on the MXU: contracts both operands on their last (H) dim
    # and produces a lane-major (1, tm) row -> unmasked, lane-dense store.
    out_row = lax.dot_general(
        w2, h, (((1,), (1,)), ((), ())),
        preferred_element_type=jnp.float32) + b2               # (1, tm)

    o_ref[...] = out_row.reshape(o_ref.shape).astype(o_ref.dtype)


def mlp_forward(x, packed_params, *, block_m=1024):
    """x: [B, F] (f32 or bf16); packed_params from pack_params() -> [B, 1] f32."""
    B, F = x.shape
    H = packed_params.shape[1]
    assert packed_params.shape[0] >= F + 3

    # Batch tile: as large as possible to amortize per-step overhead, multiple of
    # the sublane tile (16 covers bf16 and f32), but capped so the grid keeps at
    # least 2 steps when B allows it (lets v7x's two TensorCores split the work).
    sub = 16 if x.dtype == jnp.bfloat16 else 8
    tm = max(sub, min(block_m, _round_up(pl.cdiv(B, 2), sub)))
    nb = pl.cdiv(B, tm)

    cost = pl.CostEstimate(
        flops=2 * B * F * H + 2 * B * H + 2 * B * H + B,  # fc1 + bias/relu + fc2
        transcendentals=0,
        bytes_accessed=(B * F * x.dtype.itemsize
                        + packed_params.size * 4
                        + B * 4),
    )

    out = pl.pallas_call(
        functools.partial(mlp_kernel, n_in=F),
        out_shape=jax.ShapeDtypeStruct((nb, 1, tm), jnp.float32),
        grid=(nb,),
        in_specs=[
            # x: tiled over the batch axis; last dim is the true F (full dim).
            pl.BlockSpec((tm, F), lambda i: (i, 0)),
            # packed params: constant block index -> resident, fetched once.
            pl.BlockSpec(packed_params.shape, lambda i: (0, 0)),
        ],
        # Lane-dense output: one (1, 1, tm) row per grid step.
        out_specs=pl.BlockSpec((1, 1, tm), lambda i: (i, 0, 0)),
        compiler_params=pltpu.CompilerParams(
            dimension_semantics=("parallel",),
        ),
        cost_estimate=cost,
    )(x, packed_params)

    # (nb, 1, tm) -> (nb*tm, 1); rows beyond B (partial last block) are garbage
    # by construction and are sliced off here.
    return out.reshape(nb * tm, 1)[:B]


def init_params(key, in_features, hidden=64, out_features=1):
    # Deterministic init mimicking nn.Linear default: U(-1/sqrt(fan_in), 1/sqrt(fan_in)).
    k1, k2, k3, k4 = jax.random.split(key, 4)
    bound1 = 1.0 / jnp.sqrt(jnp.float32(in_features))
    bound2 = 1.0 / jnp.sqrt(jnp.float32(hidden))
    w1 = jax.random.uniform(k1, (in_features, hidden), jnp.float32, -bound1, bound1)
    b1 = jax.random.uniform(k2, (1, hidden), jnp.float32, -bound1, bound1)
    w2 = jax.random.uniform(k3, (hidden, out_features), jnp.float32, -bound2, bound2)
    b2 = jax.random.uniform(k4, (1, out_features), jnp.float32, -bound2, bound2)
    return w1, b1, w2, b2


if __name__ == "__main__":
    key = jax.random.PRNGKey(0)
    kx, kp = jax.random.split(key)

    batch = 8
    in_features = 16  # stands in for X_train.shape[1] (number of tabular feature columns)

    x = jax.random.normal(kx, (batch, in_features), dtype=jnp.float32)
    w1, b1, w2, b2 = init_params(kp, in_features)

    # Pack parameters ONCE at init (not per forward call).
    params = pack_params(w1, b1, w2, b2)

    fwd = jax.jit(mlp_forward)
    out = jax.block_until_ready(fwd(x, params))

    # Reference check in plain JAX (same math as the PyTorch forward), f32 path is exact.
    ref = jnp.maximum(x @ w1 + b1, 0.0) @ w2 + b2
    assert out.shape == (batch, 1)
    assert jnp.allclose(out, ref, atol=1e-5, rtol=1e-5)

    print("KERNEL_OK")
</pallas_src>

<mosaic_0001>
module attributes {stable_mosaic.version = 11 : i64} {
  func.func @mlp_kernel(%arg0: i32, %arg1: memref<8x16xf32, #tpu.memory_space<vmem>>, %arg2: memref<24x64xf32, #tpu.memory_space<vmem>>, %arg3: memref<1x1x8xf32, #tpu.memory_space<vmem>>) attributes {dimension_semantics = [#tpu.dimension_semantics<parallel>], iteration_bounds = array<i64: 1>, scalar_prefetch = 0 : i64, scratch_operands = 0 : i64, tpu.core_type = #tpu.core_type<tc>, window_params = [{transform_indices = @transform_0, window_bounds = array<i64: 8, 16>}, {pipeline_mode = #tpu.pipeline_mode<synchronous>, transform_indices = @transform_1, window_bounds = array<i64: 24, 64>}, {transform_indices = @transform_2, window_bounds = array<i64: 1, 1, 8>}]} {
    %c0 = arith.constant 0 : index
    %c0_0 = arith.constant 0 : index
    %0 = vector.load %arg1[%c0, %c0_0] : memref<8x16xf32, #tpu.memory_space<vmem>>, vector<8x16xf32>
    %c0_1 = arith.constant 0 : index
    %c0_2 = arith.constant 0 : index
    %1 = vector.load %arg2[%c0_1, %c0_2] : memref<24x64xf32, #tpu.memory_space<vmem>>, vector<16x64xf32>
    %c16 = arith.constant 16 : index
    %c0_3 = arith.constant 0 : index
    %2 = vector.load %arg2[%c16, %c0_3] : memref<24x64xf32, #tpu.memory_space<vmem>>, vector<1x64xf32>
    %c17 = arith.constant 17 : index
    %c0_4 = arith.constant 0 : index
    %3 = vector.load %arg2[%c17, %c0_4] : memref<24x64xf32, #tpu.memory_space<vmem>>, vector<1x64xf32>
    %c18 = arith.constant 18 : index
    %c0_5 = arith.constant 0 : index
    %4 = vector.load %arg2[%c18, %c0_5] : memref<24x64xf32, #tpu.memory_space<vmem>>, vector<1x1xf32>
    %cst = arith.constant dense<0.000000e+00> : vector<8x64xf32>
    %5 = tpu.matmul %0, %1, %cst {dimension_numbers = #tpu.dot_dimension_numbers<[1], [0], [0], [1], [0, 0, 1, 1], [], []>} : vector<8x16xf32>, vector<16x64xf32>, vector<8x64xf32> -> vector<8x64xf32>
    %6 = vector.broadcast %2 : vector<1x64xf32> to vector<8x64xf32>
    %7 = arith.addf %5, %6 : vector<8x64xf32>
    %cst_6 = arith.constant 0.000000e+00 : f32
    %8 = vector.broadcast %cst_6 : f32 to vector<8x64xf32>
    %9 = arith.maximumf %7, %8 : vector<8x64xf32>
    %cst_7 = arith.constant dense<0.000000e+00> : vector<1x8xf32>
    %10 = tpu.matmul %3, %9, %cst_7 {dimension_numbers = #tpu.dot_dimension_numbers<[1], [1], [0], [0], [0, 0, 1, 0], [], []>} : vector<1x64xf32>, vector<8x64xf32>, vector<1x8xf32> -> vector<1x8xf32>
    %11 = vector.broadcast %4 : vector<1x1xf32> to vector<1x8xf32>
    %12 = arith.addf %10, %11 : vector<1x8xf32>
    %13 = vector.shape_cast %12 : vector<1x8xf32> to vector<1x1x8xf32>
    %c0_8 = arith.constant 0 : index
    %c0_9 = arith.constant 0 : index
    %c0_10 = arith.constant 0 : index
    %14 = vector.load %arg3[%c0_8, %c0_9, %c0_10] : memref<1x1x8xf32, #tpu.memory_space<vmem>>, vector<1x1x8xf32>
    tpu.vector_store %arg3[%c0_8, %c0_9, %c0_10], %13 {strides = array<i32>} : memref<1x1x8xf32, #tpu.memory_space<vmem>>, vector<1x1x8xf32>,
    return
  }
  func.func @transform_0(%arg0: i32) -> (i32, i32) {
    %c0_i32 = arith.constant 0 : i32
    %c0_i32_0 = arith.constant 0 : i32
    return %arg0, %c0_i32 : i32, i32
  }
  func.func @transform_1(%arg0: i32) -> (i32, i32) {
    %c0_i32 = arith.constant 0 : i32
    %c0_i32_0 = arith.constant 0 : i32
    %c0_i32_1 = arith.constant 0 : i32
    return %c0_i32, %c0_i32_0 : i32, i32
  }
  func.func @transform_2(%arg0: i32) -> (i32, i32, i32) {
    %c0_i32 = arith.constant 0 : i32
    %c0_i32_0 = arith.constant 0 : i32
    %c0_i32_1 = arith.constant 0 : i32
    return %arg0, %c0_i32, %c0_i32_0 : i32, i32, i32
  }
}

</mosaic_0001>

<bundles_post_ra>
// kernel: mlp_forward.1
= control target key start
LH: loop header
LB: loop body
LE: loop exit
PB: predicated region body
PF: predicated region fallthrough
CT: control target
= control target key end

     0   :  { %7 = vsyncpa [#allocation3], 0  ;;  %s396_s0 = inlined_call_operand.hbm [shape: f32[8,16], index: 0, kind: input, shape index: {}]   ;;  %s397_s1 = inlined_call_operand.hbm [shape: f32[24,64], index: 1, kind: input, shape index: {}]   ;;  %s398_s2 = inlined_call_operand.hbm [shape: f32[1,1,8], index: 2, kind: output, shape index: {}]  }
   0x1   :  { %8 = vsyncpa [#allocation6], 0 }
   0x2   :  { %9 = vsyncpa [#allocation4], 0  ;;  %s329_s9 = smov [#allocation2]   ;;  %s330_s11 = smov [#allocation5]  }
   0x3   :  { %s16_s10 = sshll.u32 %s329_s9, 4  ;;  %s25_s12 = sshll.u32 %s330_s11, 4  ;;  %s17_s10 = int_to_ptr.vmem [resolvable:$true] %s16_s10  ;;  %s353_s12 = int_to_ptr.vmem [resolvable:$true] %s25_s12 }
   0x4   :  { %s257_s15 = scalar_lea.hbm %s396_s0, 128 }
   0x5   :  { %p258_p0 = scmp.ne.s32.totalorder %s396_s0, %s257_s15  ;;  %p261_p1 = scmp.lt.u32.totalorder %s257_s15, %s396_s0 }
   0x7   :  { %p263_p2 = pnand %p261_p1, %p258_p0 }
   0x9   :  { %266 = shalt.err (!%p263_p2)
}
   0xa   :  { %s267_s20 = scalar_lea.vmem %s17_s10, 128  ;;  %p272_p4 = scmp.lt.s32.totalorder %s17_s10, %s17_s10 }
   0xb   :  { %p268_p3 = scmp.ne.s32.totalorder %s17_s10, %s267_s20  ;;  %p273_p5 = scmp.lt.s32.totalorder %s267_s20, %s267_s20 }
   0xd   :  { %p274_p6 = por %p273_p5, %p272_p4 }
   0xf   :  { %p275_p7 = pnand %p274_p6, %p268_p3 }
  0x11   :  { %278 = shalt.err (!%p275_p7)
}
  0x12   :  { %19 = dma.hbm_to_vmem [thread:$0]  %s396_s0, 128, %s17_s10, [#allocation3]  }
  0x13   :  { %s279_s25 = scalar_lea.hbm %s397_s1, 384 }
  0x14   :  { %p280_p8 = scmp.ne.s32.totalorder %s397_s1, %s279_s25  ;;  %p283_p9 = scmp.lt.u32.totalorder %s279_s25, %s397_s1 }
  0x16   :  { %p285_p10 = pnand %p283_p9, %p280_p8 }
  0x18   :  { %288 = shalt.err (!%p285_p10)
}
  0x19   :  { %s289_s30 = scalar_lea.vmem %s353_s12, 384  ;;  %p294_p12 = scmp.lt.s32.totalorder %s353_s12, %s353_s12 }
  0x1a   :  { %p290_p11 = scmp.ne.s32.totalorder %s353_s12, %s289_s30  ;;  %p295_p13 = scmp.lt.s32.totalorder %s289_s30, %s289_s30 }
  0x1c   :  { %p296_p0 = por %p295_p13, %p294_p12 }
  0x1e   :  { %p297_p1 = pnand %p296_p0, %p290_p11 }
  0x20   :  { %300 = shalt.err (!%p297_p1)
}
  0x21   :  { %s331_s0 = smov 128   ;;  %s332_s3 = smov 8  }
  0x22   :  { %31 = dma.hbm_to_vmem [thread:$0]  %s397_s1, 384, %s353_s12, [#allocation6], %s331_s0, %s331_s0, %s332_s3  }
  0x23   :  { %323 = dma.done.wait [#allocation3], 128  }
  0x24   :  { %324 = vsyncadd [#allocation3], 4294967168 }
  0x25   :  { %325 = dma.done.wait [#allocation6], 384  }
  0x26   :  { %326 = vsyncadd [#allocation6], 4294966912  ;;  %v333_v0 = vmov 0.0|0.0   ;;  %vm334_vm0 = vmmov 0   ;;  %v335_v1 = vmov 0.0   ;;  %v39_v2 = vld [vmem:[#allocation5] sm:$0xff] }
  0x27   :  { %244 = vmatprep.subr.bf16.mxu0 %v333_v0  ;;  %236 = vmatprep.mubr.msk.f32.mxu0 %vm334_vm0, %v335_v1  ;;  %v40_v3 = vld [vmem:[#allocation5 + $0x8] sm:$0xff]  ;;  %v38_v5 = vld [vmem:[#allocation2] sm:$0xff]  ;;  %vm48_vm1 = vcmask 130048   ;;  %v43_v6 = vld [vmem:[#allocation5 + $0x12] sm:$0x1]  ;;  %v336_v7 = vmov 0  }
  0x28   :  { %239 = vmatprep.subr.mxu1 %v335_v1  ;;  %241 = vmatprep.mubr.msk.f32.mxu1 %vm334_vm0, %v335_v1  ;;  %v245_v4 = vpack.c.bf16 %v40_v3, %v39_v2  ;;  %v223_v8 = vld [vmem:[#allocation5 + $0x10] ss:$0 sm:$0xff]  ;;  %vm128_vm2 = vcmask 523264   ;;  %v42_v13 = vld [vmem:[#allocation5 + $0x11] sm:$0x1]  ;;  %s337_s1 = smov [#allocation7]  }
  0x29   :  { %256 = vset.pattern.permute.xlu0 %v336_v7  ;;  %s213_s6 = sshll.u32 %s337_s1, 4  ;;  %vm205_vm3 = vcmask 57344   ;;  %s214_s6 = int_to_ptr.vmem [resolvable:$true] %s213_s6 }
  0x2a   :  { %246 = vmatpush3.bf16.msra.mxu0 %v245_v4  ;;  %125 = vperm.xlu0 %256, %v43_v6   ;;  %s301_s7 = scalar_lea.vmem %s214_s6, 16  ;;  %s305_s8 = scalar_lea.vmem %s214_s6, 32 }
  0x2b   :  { %p302_p2 = scmp.ne.s32.totalorder %s214_s6, %s301_s7  ;;  %p306_p3 = scmp.lt.s32.totalorder %s214_s6, %s214_s6 }
  0x2c   :  { %p307_p4 = scmp.lt.s32.totalorder %s305_s8, %s301_s7 }
  0x2d   :  { %237 = vmatmul.mubr.msk.f32.vlgmr.msra.gmra.mrb[0].mxu0 %vm48_vm1, %v38_v5 }
  0x2e   :  { %p308_p5 = por %p307_p4, %p306_p3 }
  0x30   :  { %p309_p6 = pnand %p308_p5, %p302_p2 }
  0xa9   :  { %v126_v14 = vpop.permute.xlu0 %125 }
 0x100   :  { %v118_v9 = vpop.f32.mrb[0].mxu0 }
 0x101   :  { %v119_v10 = vadd.f32 %v223_v8, %v118_v9  ;;  %v238_v11 = vpop.f32.mrb[1].mxu0 }
 0x103   :  { %v122_v12 = vmax.f32 %v119_v10, 0.0 }
 0x105   :  { %240 = vmatpush3.xpose.msk.msra.mxu1 %vm128_vm2, %v122_v12 }
 0x108   :  { %242 = vmatmul.mubr.msk.f32.vlgmr.msra.gmra.mrb[0].mxu1 %vm128_vm2, %v42_v13 }
 0x1db   :  { %v201_v15 = vpop.f32.mrb[0].mxu1 }
 0x1dc   :  { %v202_v16 = vadd.f32 %v201_v15, %v126_v14  ;;  %v243_v17 = vpop.f32.mrb[1].mxu1 }
 0x1de   :  { %206 = vst.msk [vmem:[#allocation7] sm:$0x1] %vm205_vm3, %v202_v16 }
 0x1df   :  { %312 = shalt.err (!%p309_p6)
}
 0x1e0   :  { %s313_s11 = scalar_lea.hbm %s398_s2, 16 }
 0x1e1   :  { %p314_p7 = scmp.ne.s32.totalorder %s398_s2, %s313_s11  ;;  %p317_p8 = scmp.lt.u32.totalorder %s313_s11, %s398_s2 }
 0x1e3   :  { %p319_p9 = pnand %p317_p8, %p314_p7 }
 0x1e5   :  { %322 = shalt.err (!%p319_p9)
}
 0x1e6   :  { %216 = dma.vmem_to_hbm [thread:$0]  %s214_s6, 16, %s398_s2, [#allocation4]  }
 0x1e7   :  { %327 = dma.done.wait [#allocation4], 16  }
 0x1e8   :  { %328 = vsyncadd [#allocation4], 4294967280 }
 0x1e9   :  { %220 = vsyncpa [#allocation3], 1 }
 0x1ea   :  { %221 = vsyncpa [#allocation6], 1 }
 0x1eb   :  { %222 = vsyncpa [#allocation4], 1 }

</bundles_post_ra>
